<compile_context>
chip_gen: v6e
topology: v6e:2x2x1
jax: 0.10.0
libtpu: 0.0.40
codegen_flags: <defaults>
</compile_context>

<pallas_src>
import functools

import jax
import jax.numpy as jnp
from jax.experimental import pallas as pl
from jax.experimental.pallas import tpu as pltpu


def attention_kernel(h_ref, wt_ref, b_ref, o_ref, *, tb, seq, dim):
    # h_ref : (tb, S, D) tile of batch rows (native input dtype)
    # wt_ref: (D, D)     transposed Linear weight (in, out), resident (bf16)
    # b_ref : (1, D)     Linear bias (f32), resident
    # o_ref : (tb, D)    output tile
    h = h_ref[...]                                              # (tb, S, D)

    if seq % 8 == 0:
        # Fold (tb, S) into the MXU M dimension (sublane-safe: S % 8 == 0).
        x = jnp.dot(h.reshape(tb * seq, dim).astype(wt_ref.dtype), wt_ref[...],
                    preferred_element_type=jnp.float32)         # (tb*S, D) f32
        x = jnp.tanh(x + b_ref[...])                            # bounded [-1, 1]
        e = jnp.exp(x).reshape(tb, seq, dim)                    # (tb, S, D) f32
    else:
        # Avoid the sublane-crossing reshape when S is not a multiple of 8.
        x = jax.lax.dot_general(h.astype(wt_ref.dtype), wt_ref[...],
                                (((2,), (0,)), ((), ())),
                                preferred_element_type=jnp.float32)  # (tb,S,D)
        x = jnp.tanh(x + b_ref[...])
        e = jnp.exp(x)

    # Softmax over the sequence axis (dim=1), normalization folded into the
    # weighted sum:  out = (sum_s e * h) / (sum_s e).
    denom = jnp.sum(e, axis=1)                                  # (tb, D) f32
    num = jnp.sum(e * h, axis=1)                                # f32 accumulate
    o_ref[...] = (num * pl.reciprocal(denom, approx=True)).astype(o_ref.dtype)


def _round_up(x, m):
    return -(-x // m) * m


def _choose_tb(B, S, D, itemsize, budget_bytes=20 * 1024 * 1024):
    """Pick the batch tile: fill the MXU M dim, stay inside a VMEM budget."""
    # Target tb*S >= ~512 rows to amortize per-step overhead / fill the MXU.
    tb = _round_up(max(8, -(-512 // S)), 8)
    # Rough per-batch-row VMEM cost: double-buffered input tile (native dtype)
    # + ~3 f32 full-tile intermediates (x, e, slack) + double-buffered output.
    per_b = S * D * (2 * itemsize + 3 * 4) + 2 * D * itemsize
    resident = D * D * 2 + D * 4                     # bf16 W^T + f32 bias
    avail = max(budget_bytes - resident, per_b * 8)
    tb = min(tb, max(8, (avail // per_b) // 8 * 8))
    # No point tiling past the (rounded-up) batch.
    tb = min(tb, _round_up(B, 8))
    # Keep >= 2 grid steps when B allows so "parallel" can shard v7x's 2 TCs.
    if B >= 16:
        tb = min(tb, max(8, ((B + 1) // 2) // 8 * 8))
    return tb


def attention_forward(h, weight, bias, *, tb=None, mxu_dtype=jnp.bfloat16):
    """h: (B, S, D); weight: (D, D) as nn.Linear (out, in); bias: (D,)."""
    B, S, D = h.shape
    itemsize = jnp.dtype(h.dtype).itemsize
    if tb is None:
        tb = _choose_tb(B, S, D, itemsize)

    wt = weight.T.astype(mxu_dtype)                 # (D_in, D_out): kernel does h @ wt
    b2 = bias.reshape(1, D).astype(jnp.float32)

    grid = (pl.cdiv(B, tb),)
    kernel = functools.partial(attention_kernel, tb=tb, seq=S, dim=D)

    # Explicit scoped-VMEM limit: v5e's default is only 16 MiB; keep well under
    # v7x's 64 MiB physical per TC.
    w_bytes = D * D * jnp.dtype(mxu_dtype).itemsize
    est_vmem = (2 * tb * S * D * itemsize           # double-buffered h tile
                + 2 * tb * D * itemsize             # double-buffered output tile
                + w_bytes + D * 4                   # resident W^T + bias (1-buf)
                + 3 * tb * S * D * 4)               # f32 intermediates (x, e, slack)
    vmem_limit = int(max(32 * 1024 * 1024,
                         min(48 * 1024 * 1024, est_vmem * 3 // 2)))

    cost = pl.CostEstimate(
        flops=2 * B * S * D * D,
        transcendentals=2 * B * S * D,
        bytes_accessed=B * S * D * itemsize + w_bytes + D * 4 + B * D * itemsize,
    )

    return pl.pallas_call(
        kernel,
        out_shape=jax.ShapeDtypeStruct((B, D), h.dtype),
        grid_spec=pltpu.PrefetchScalarGridSpec(
            num_scalar_prefetch=0,
            grid=grid,
            in_specs=[
                pl.BlockSpec((tb, S, D), lambda i: (i, 0, 0)),      # h batch tile
                pl.BlockSpec((D, D), lambda i: (0, 0),
                             pipeline_mode=pl.Buffered(1)),         # W^T resident
                pl.BlockSpec((1, D), lambda i: (0, 0),
                             pipeline_mode=pl.Buffered(1)),         # bias resident
            ],
            out_specs=pl.BlockSpec((tb, D), lambda i: (i, 0)),
        ),
        compiler_params=pltpu.CompilerParams(
            dimension_semantics=("parallel",),      # shards across TCs on v7x
            vmem_limit_bytes=vmem_limit,
        ),
        cost_estimate=cost,
    )(h, wt, b2)


def attention_ref(h, weight, bias):
    x = jnp.einsum("bsd,od->bso", h, weight) + bias
    x = jnp.tanh(x)
    x = jax.nn.softmax(x, axis=1)
    return jnp.sum(x * h, axis=1)


if __name__ == "__main__":
    B, S, D = 2, 8, 128
    key = jax.random.PRNGKey(0)
    kh, kw, kb = jax.random.split(key, 3)

    h = jax.random.normal(kh, (B, S, D), dtype=jnp.float32)
    # deterministic nn.Linear-style init: U(-1/sqrt(D), 1/sqrt(D))
    bound = 1.0 / jnp.sqrt(jnp.float32(D))
    weight = jax.random.uniform(kw, (D, D), dtype=jnp.float32,
                                minval=-bound, maxval=bound)
    bias = jax.random.uniform(kb, (D,), dtype=jnp.float32,
                              minval=-bound, maxval=bound)

    out = attention_forward(h, weight, bias)
    out = jax.block_until_ready(out)

    ref = attention_ref(h, weight, bias)
    assert out.shape == (B, D)
    # tolerance loosened for bf16 MXU inputs + approx reciprocal
    assert jnp.allclose(out, ref, atol=2e-2, rtol=2e-2), \
        f"max diff {jnp.max(jnp.abs(out - ref))}"

    print("KERNEL_OK")
</pallas_src>

<mosaic_0001>
module attributes {stable_mosaic.version = 11 : i64} {
  func.func @attention_kernel(%arg0: i32, %arg1: memref<8x8x128xf32, #tpu.memory_space<vmem>>, %arg2: memref<128x128xbf16, #tpu.memory_space<vmem>>, %arg3: memref<1x128xf32, #tpu.memory_space<vmem>>, %arg4: memref<8x128xf32, #tpu.memory_space<vmem>>) attributes {dimension_semantics = [#tpu.dimension_semantics<parallel>], iteration_bounds = array<i64: 1>, scalar_prefetch = 0 : i64, scratch_operands = 0 : i64, tpu.core_type = #tpu.core_type<tc>, window_params = [{transform_indices = @transform_0, window_bounds = array<i64: 8, 8, 128>}, {pipeline_mode = #tpu.pipeline_mode<synchronous>, transform_indices = @transform_1, window_bounds = array<i64: 128, 128>}, {pipeline_mode = #tpu.pipeline_mode<synchronous>, transform_indices = @transform_2, window_bounds = array<i64: 1, 128>}, {transform_indices = @transform_3, window_bounds = array<i64: 8, 128>}]} {
    %c0 = arith.constant 0 : index
    %c0_0 = arith.constant 0 : index
    %c0_1 = arith.constant 0 : index
    %0 = vector.load %arg1[%c0, %c0_0, %c0_1] : memref<8x8x128xf32, #tpu.memory_space<vmem>>, vector<8x8x128xf32>
    %1 = vector.shape_cast %0 : vector<8x8x128xf32> to vector<64x128xf32>
    %2 = arith.truncf %1 : vector<64x128xf32> to vector<64x128xbf16>
    %c0_2 = arith.constant 0 : index
    %c0_3 = arith.constant 0 : index
    %3 = vector.load %arg2[%c0_2, %c0_3] : memref<128x128xbf16, #tpu.memory_space<vmem>>, vector<128x128xbf16>
    %cst = arith.constant dense<0.000000e+00> : vector<64x128xf32>
    %4 = tpu.matmul %2, %3, %cst {dimension_numbers = #tpu.dot_dimension_numbers<[1], [0], [0], [1], [0, 0, 1, 1], [], []>} : vector<64x128xbf16>, vector<128x128xbf16>, vector<64x128xf32> -> vector<64x128xf32>
    %c0_4 = arith.constant 0 : index
    %c0_5 = arith.constant 0 : index
    %5 = vector.load %arg3[%c0_4, %c0_5] : memref<1x128xf32, #tpu.memory_space<vmem>>, vector<1x128xf32>
    %6 = vector.broadcast %5 : vector<1x128xf32> to vector<64x128xf32>
    %7 = arith.addf %4, %6 : vector<64x128xf32>
    %8 = math.tanh %7 : vector<64x128xf32>
    %9 = math.exp %8 : vector<64x128xf32>
    %10 = vector.shape_cast %9 : vector<64x128xf32> to vector<8x8x128xf32>
    %cst_6 = arith.constant dense<0.000000e+00> : vector<8x128xf32>
    %11 = vector.multi_reduction <add>, %10, %cst_6 [1] : vector<8x8x128xf32> to vector<8x128xf32>
    %12 = arith.mulf %10, %0 : vector<8x8x128xf32>
    %cst_7 = arith.constant dense<0.000000e+00> : vector<8x128xf32>
    %13 = vector.multi_reduction <add>, %12, %cst_7 [1] : vector<8x8x128xf32> to vector<8x128xf32>
    %14 = tpu.reciprocal %11 {approx = true} : vector<8x128xf32> -> vector<8x128xf32>
    %15 = arith.mulf %13, %14 : vector<8x128xf32>
    %c0_8 = arith.constant 0 : index
    %c0_9 = arith.constant 0 : index
    %16 = vector.load %arg4[%c0_8, %c0_9] : memref<8x128xf32, #tpu.memory_space<vmem>>, vector<8x128xf32>
    tpu.vector_store %arg4[%c0_8, %c0_9], %15 {strides = array<i32>} : memref<8x128xf32, #tpu.memory_space<vmem>>, vector<8x128xf32>,
    return
  }
  func.func @transform_0(%arg0: i32) -> (i32, i32, i32) {
    %c0_i32 = arith.constant 0 : i32
    %c0_i32_0 = arith.constant 0 : i32
    %c0_i32_1 = arith.constant 0 : i32
    return %arg0, %c0_i32, %c0_i32_0 : i32, i32, i32
  }
  func.func @transform_1(%arg0: i32) -> (i32, i32) {
    %c0_i32 = arith.constant 0 : i32
    %c0_i32_0 = arith.constant 0 : i32
    %c0_i32_1 = arith.constant 0 : i32
    return %c0_i32, %c0_i32_0 : i32, i32
  }
  func.func @transform_2(%arg0: i32) -> (i32, i32) {
    %c0_i32 = arith.constant 0 : i32
    %c0_i32_0 = arith.constant 0 : i32
    %c0_i32_1 = arith.constant 0 : i32
    return %c0_i32, %c0_i32_0 : i32, i32
  }
  func.func @transform_3(%arg0: i32) -> (i32, i32) {
    %c0_i32 = arith.constant 0 : i32
    %c0_i32_0 = arith.constant 0 : i32
    return %arg0, %c0_i32 : i32, i32
  }
}

</mosaic_0001>

<bundles_post_ra>
// kernel: tpu_custom_call.1
= control target key start
LH: loop header
LB: loop body
LE: loop exit
PB: predicated region body
PF: predicated region fallthrough
CT: control target
= control target key end

     0   :  { %8 = vsyncpa [#allocation3], 0  ;;  %s652_s0 = inlined_call_operand.hbm [shape: f32[2,8,128], index: 0, kind: input, shape index: {}]   ;;  %s653_s1 = inlined_call_operand.hbm [shape: bf16[128,128], index: 1, kind: input, shape index: {}]   ;;  %s654_s2 = inlined_call_operand.vmem [shape: f32[1,128], index: 2, kind: input, shape index: {}]   ;;  %s655_s3 = inlined_call_operand.hbm [shape: f32[2,128], index: 3, kind: output, shape index: {}]  }
   0x1   :  { %9 = vsyncpa [#allocation6], 0 }
   0x2   :  { %10 = vsyncpa [#allocation4], 0 }
   0x3   :  { %15 = vsyncadd [#allocation3], 768  ;;  %s570_s12 = smov [#allocation2]  }
   0x4   :  { %s16_s13 = sshll.u32 %s570_s12, 4  ;;  %s17_s13 = int_to_ptr.vmem [resolvable:$true] %s16_s13 }
   0x5   :  { %s512_s14 = scalar_lea.vmem %s17_s13, 256  ;;  %s516_s15 = scalar_lea.vmem %s17_s13, 1024 }
   0x6   :  { %p513_p0 = scmp.ne.s32.totalorder %s17_s13, %s512_s14  ;;  %p517_p1 = scmp.lt.s32.totalorder %s17_s13, %s17_s13 }
   0x7   :  { %p518_p2 = scmp.lt.s32.totalorder %s516_s15, %s512_s14 }
   0x9   :  { %p519_p3 = por %p518_p2, %p517_p1 }
   0xb   :  { %p520_p4 = pnand %p519_p3, %p513_p0 }
   0xd   :  { %523 = shalt.err (!%p520_p4)
}
   0xe   :  { %s571_s16 = smov 128   ;;  %s572_s17 = smov 8  }
   0xf   :  { %22 = dma.hbm_to_vmem [thread:$0]  %s652_s0, 256, %s17_s13, [#allocation3], %s571_s16, %s571_s16, %s572_s17  }
  0x10   :  { %s573_s20 = smov [#allocation5]  }
  0x11   :  { %s28_s21 = sshll.u32 %s573_s20, 4  ;;  %s29_s21 = int_to_ptr.vmem [resolvable:$true] %s28_s21 }
  0x12   :  { %s532_s22 = scalar_lea.vmem %s29_s21, 1024  ;;  %p537_p6 = scmp.lt.s32.totalorder %s29_s21, %s29_s21 }
  0x13   :  { %p533_p5 = scmp.ne.s32.totalorder %s29_s21, %s532_s22  ;;  %p538_p7 = scmp.lt.s32.totalorder %s532_s22, %s532_s22 }
  0x15   :  { %p539_p8 = por %p538_p7, %p537_p6 }
  0x17   :  { %p540_p9 = pnand %p539_p8, %p533_p5 }
  0x19   :  { %543 = shalt.err (!%p540_p9)
}
  0x1a   :  { %s574_s23 = smov 64   ;;  %s575_s24 = smov 4  }
  0x1b   :  { %34 = dma.hbm_to_vmem [thread:$0]  %s653_s1, 1024, %s29_s21, [#allocation6], %s574_s23, %s574_s23, %s575_s24  }
  0x1c   :  { %564 = dma.done.wait [#allocation3], 1024  }
  0x1d   :  { %565 = vsyncadd [#allocation3], 4294966272 }
  0x1e   :  { %566 = dma.done.wait [#allocation6], 1024  }
  0x1f   :  { %567 = vsyncadd [#allocation6], 4294966272  ;;  %v448_v0 = vld [vmem:[#allocation5 + $0x38] sm:$0xff]   ;;  %v449_v1 = vld [vmem:[#allocation5 + $0x30] sm:$0xff]   ;;  %vm344_vm0 = vcmask 1041409   ;;  %vm346_vm1 = vcmask 1042434  }
  0x20   :  { %399 = vmatprep.subr.bf16.mxu0 %v448_v0  ;;  %423 = vmatprep.subr.bf16.mxu1 %v448_v0  ;;  %v450_v2 = vld [vmem:[#allocation5 + $0x28] sm:$0xff]   ;;  %v451_v3 = vld [vmem:[#allocation5 + $0x20] sm:$0xff]   ;;  %v452_v10 = vld [vmem:[#allocation5 + $0x18] sm:$0xff]   ;;  %vm348_vm2 = vcmask 1043459   ;;  %vm350_vm3 = vcmask 1044484   ;;  %vm352_vm4 = vcmask 1045509  }
  0x21   :  { %400 = vmatpush3.bf16.msra.mxu0 %v448_v0  ;;  %431 = vmatpush3.bf16.msra.mxu1 %v448_v0  ;;  %v605_v4 = vld [vmem:[#allocation2] sm:$0xff]  ;;  %v607_v5 = vld [vmem:[#allocation2 + $0x8] sm:$0xff]  ;;  %v453_v11 = vld [vmem:[#allocation5 + $0x10] sm:$0xff]   ;;  %vm354_vm5 = vcmask 1046534   ;;  %vm356_vm6 = vcmask 1047559  }
  0x22   :  { %401 = vmatprep.subr.bf16.mxu0 %v449_v1  ;;  %424 = vmatprep.subr.bf16.mxu1 %v449_v1  ;;  %v609_v6 = vld [vmem:[#allocation2 + $0x20] sm:$0xff]  ;;  %v52_v7 = vpack.c.bf16 %v607_v5, %v605_v4  ;;  %v613_v8 = vld [vmem:[#allocation2 + $0x28] sm:$0xff]  ;;  %v617_v14 = vld [vmem:[#allocation2 + $0x10] sm:$0xff] }
  0x23   :  { %v54_v9 = vpack.c.bf16 %v613_v8, %v609_v6  ;;  %v454_v12 = vld [vmem:[#allocation5 + $0x8] sm:$0xff]   ;;  %v455_v13 = vld [vmem:[#allocation5] sm:$0xff]   ;;  %v619_v15 = vld [vmem:[#allocation2 + $0x18] sm:$0xff] }
  0x24   :  { %415 = vmatprep.mubr.bf16.mxu0 %v52_v7  ;;  %v621_v16 = vld [vmem:[#allocation2 + $0x30] sm:$0xff]  ;;  %v623_v17 = vld [vmem:[#allocation2 + $0x38] sm:$0xff]  ;;  %v53_v18 = vpack.c.bf16 %v619_v15, %v617_v14  ;;  %v378_v20 = vld [vmem:[%s654_s2] ss:$0 sm:$0xff] }
  0x25   :  { %402 = vmatpush3.bf16.msra.mxu0 %v449_v1  ;;  %432 = vmatpush3.bf16.msra.mxu1 %v449_v1  ;;  %v55_v19 = vpack.c.bf16 %v623_v17, %v621_v16 }
  0x26   :  { %403 = vmatprep.subr.bf16.mxu0 %v450_v2  ;;  %425 = vmatprep.subr.bf16.mxu1 %v450_v2 }
  0x27   :  { %419 = vmatprep.mubr.bf16.mxu1 %v54_v9 }
  0x29   :  { %404 = vmatpush3.bf16.msra.mxu0 %v450_v2  ;;  %433 = vmatpush3.bf16.msra.mxu1 %v450_v2 }
  0x2a   :  { %405 = vmatprep.subr.bf16.mxu0 %v451_v3  ;;  %426 = vmatprep.subr.bf16.mxu1 %v451_v3 }
  0x2d   :  { %406 = vmatpush3.bf16.msra.mxu0 %v451_v3  ;;  %434 = vmatpush3.bf16.msra.mxu1 %v451_v3 }
  0x2e   :  { %407 = vmatprep.subr.bf16.mxu0 %v452_v10  ;;  %427 = vmatprep.subr.bf16.mxu1 %v452_v10 }
  0x31   :  { %408 = vmatpush3.bf16.msra.mxu0 %v452_v10  ;;  %435 = vmatpush3.bf16.msra.mxu1 %v452_v10 }
  0x32   :  { %409 = vmatprep.subr.bf16.mxu0 %v453_v11  ;;  %428 = vmatprep.subr.bf16.mxu1 %v453_v11 }
  0x35   :  { %410 = vmatpush3.bf16.msra.mxu0 %v453_v11  ;;  %436 = vmatpush3.bf16.msra.mxu1 %v453_v11 }
  0x36   :  { %411 = vmatprep.subr.bf16.mxu0 %v454_v12  ;;  %429 = vmatprep.subr.bf16.mxu1 %v454_v12 }
  0x39   :  { %412 = vmatpush3.bf16.msra.mxu0 %v454_v12  ;;  %437 = vmatpush3.bf16.msra.mxu1 %v454_v12 }
  0x3a   :  { %413 = vmatprep.subr.bf16.mxu0 %v455_v13  ;;  %430 = vmatprep.subr.bf16.mxu1 %v455_v13 }
  0x3d   :  { %414 = vmatpush3.bf16.msra.mxu0 %v455_v13  ;;  %438 = vmatpush3.bf16.msra.mxu1 %v455_v13 }
  0x40   :  { %416 = vmatmul.mubr.bf16.vlgmr.msra.gmra.mxu0 %v53_v18  ;;  %420 = vmatmul.mubr.bf16.vlgmr.msra.gmra.mxu1 %v55_v19 }
 0x100   :  { %v417_v21 = vpop.f32.mrf.mxu0  ;;  %v421_v22 = vpop.f32.mrf.mxu1 }
 0x101   :  { %v170_v23 = vadd.f32 %v417_v21, %v378_v20  ;;  %v186_v24 = vadd.f32 %v421_v22, %v378_v20 }
 0x102   :  { %v161_v25 = vpop.f32.mrf.mxu0  ;;  %v177_v26 = vpop.f32.mrf.mxu1 }
 0x103   :  { %456 = vtanh.f32 %v170_v23  ;;  %v162_v27 = vadd.f32 %v378_v20, %v161_v25  ;;  %v178_v28 = vadd.f32 %v378_v20, %v177_v26 }
 0x104   :  { %458 = vtanh.f32 %v186_v24  ;;  %v418_v29 = vpop.f32.mrf.mxu0  ;;  %v422_v30 = vpop.f32.mrf.mxu1 }
 0x105   :  { %460 = vtanh.f32 %v162_v27  ;;  %v173_v32 = vadd.f32 %v418_v29, %v378_v20  ;;  %v189_v34 = vadd.f32 %v422_v30, %v378_v20 }
 0x106   :  { %462 = vtanh.f32 %v178_v28  ;;  %v164_v31 = vpop.f32.mrf.mxu0  ;;  %v180_v33 = vpop.f32.mrf.mxu1 }
 0x107   :  { %v165_v35 = vadd.f32 %v378_v20, %v164_v31  ;;  %v181_v36 = vadd.f32 %v378_v20, %v180_v33  ;;  %464 = vtanh.f32 %v173_v32 }
 0x108   :  { %466 = vtanh.f32 %v189_v34 }
 0x109   :  { %468 = vtanh.f32 %v165_v35 }
 0x10a   :  { %470 = vtanh.f32 %v181_v36 }
 0x110   :  { %v457_v37 = vpop.eup %456 }
 0x111   :  { %v459_v38 = vpop.eup %458  ;;  %v204_v39 = vmul.f32 1.442695, %v457_v37 }
 0x112   :  { %v461_v40 = vpop.eup %460  ;;  %v212_v43 = vmul.f32 1.442695, %v459_v38 }
 0x113   :  { %v463_v41 = vpop.eup %462  ;;  %472 = vpow2.f32 %v204_v39  ;;  %v200_v42 = vmul.f32 1.442695, %v461_v40 }
 0x114   :  { %v208_v44 = vmul.f32 1.442695, %v463_v41  ;;  %v465_v45 = vpop.eup %464 }
 0x115   :  { %474 = vpow2.f32 %v200_v42  ;;  %v467_v46 = vpop.eup %466  ;;  %v206_v49 = vmul.f32 1.442695, %v465_v45 }
 0x116   :  { %476 = vpow2.f32 %v208_v44  ;;  %v469_v47 = vpop.eup %468  ;;  %v214_v50 = vmul.f32 1.442695, %v467_v46 }
 0x117   :  { %478 = vpow2.f32 %v212_v43  ;;  %v471_v48 = vpop.eup %470  ;;  %v202_v51 = vmul.f32 1.442695, %v469_v47 }
 0x118   :  { %v210_v52 = vmul.f32 1.442695, %v471_v48  ;;  %480 = vpow2.f32 %v206_v49 }
 0x119   :  { %482 = vpow2.f32 %v214_v50 }
 0x11a   :  { %484 = vpow2.f32 %v202_v51 }
 0x11b   :  { %486 = vpow2.f32 %v210_v52 }
 0x120   :  { %v473_v53 = vpop.eup %472 }
 0x121   :  { %v228_v54 = vrot.slane %v473_v53, 4  ;;  %v266_v62 = vmul.f32 %v473_v53, %v617_v14 }
 0x122   :  { %v475_v55 = vpop.eup %474 }
 0x123   :  { %v477_v56 = vpop.eup %476  ;;  %v216_v57 = vrot.slane %v475_v55, 4  ;;  %v229_v59 = vadd.f32 %v473_v53, %v228_v54  ;;  %v284_v9 = vrot.slane %v266_v62, 4  ;;  %v264_v11 = vmul.f32 %v475_v55, %v605_v4 }
 0x124   :  { %v479_v58 = vpop.eup %478  ;;  %v240_v61 = vrot.slane %v477_v56, 4  ;;  %v268_v22 = vmul.f32 %v477_v56, %v609_v6 }
 0x125   :  { %v217_v60 = vadd.f32 %v475_v55, %v216_v57  ;;  %v252_v63 = vrot.slane %v479_v58, 4  ;;  %v230_v0 = vrot.slane %v229_v59, 2  ;;  %v634_v3 = vmul.f32 %v479_v58, %v621_v16  ;;  %v481_v7 = vpop.eup %480 }
 0x126   :  { %v241_v2 = vadd.f32 %v477_v56, %v240_v61  ;;  %v483_v12 = vpop.eup %482  ;;  %v234_v23 = vrot.slane %v481_v7, 4  ;;  %v639_v24 = vadd.f32 %v284_v9, %v266_v62  ;;  %v272_v25 = vrot.slane %v264_v11, 4 }
 0x127   :  { %v218_v1 = vrot.slane %v217_v60, 2  ;;  %v253_v10 = vadd.f32 %v479_v58, %v252_v63  ;;  %v231_v13 = vadd.f32 %v230_v0, %v229_v59  ;;  %v485_v18 = vpop.eup %484  ;;  %v308_v14 = vrot.slane %v634_v3, 4 }
 0x128   :  { %v242_v20 = vrot.slane %v241_v2, 2  ;;  %v487_v21 = vpop.eup %486  ;;  %v258_v26 = vrot.slane %v483_v12, 4  ;;  %v235_v28 = vadd.f32 %v481_v7, %v234_v23  ;;  %v222_v29 = vrot.slane %v485_v18, 4 }
 0x129   :  { %v219_v19 = vadd.f32 %v218_v1, %v217_v60  ;;  %v254_v16 = vrot.slane %v253_v10, 2  ;;  %v232_v27 = vrot.slane %v231_v13, 1  ;;  %v265_v4 = vmul.f32 %v485_v18, %v607_v5 }
 0x12a   :  { %v243_v31 = vadd.f32 %v242_v20, %v241_v2  ;;  %v259_v32 = vadd.f32 %v483_v12, %v258_v26  ;;  %v246_v33 = vrot.slane %v487_v21, 4  ;;  %v296_v34 = vrot.slane %v268_v22, 4 }
 0x12b   :  { %v220_v30 = vrot.slane %v219_v19, 1  ;;  %v236_v35 = vrot.slane %v235_v28, 2  ;;  %v267_v36 = vmul.f32 %v481_v7, %v619_v15  ;;  %v223_v6 = vadd.f32 %v485_v18, %v222_v29 }
 0x12c   :  { %v255_v37 = vadd.f32 %v254_v16, %v253_v10  ;;  %v260_v38 = vrot.slane %v259_v32, 2  ;;  %v247_v39 = vadd.f32 %v487_v21, %v246_v33  ;;  %v269_v40 = vmul.f32 %v487_v21, %v613_v8 }
 0x12d   :  { %v233_v41 = vadd.f32 %v232_v27, %v231_v13  ;;  %v237_v42 = vadd.f32 %v236_v35, %v235_v28  ;;  %v224_v43 = vrot.slane %v223_v6, 2  ;;  %v278_v44 = vrot.slane %v265_v4, 4 }
 0x12e   :  { %v221_v45 = vadd.f32 %v220_v30, %v219_v19  ;;  %v244_v5 = vrot.slane %v243_v31, 1  ;;  %v261_v46 = vadd.f32 %v260_v38, %v259_v32  ;;  %v248_v47 = vrot.slane %v247_v39, 2 }
 0x12f   :  { %v238_v48 = vrot.slane %v237_v42, 1  ;;  %v290_v49 = vrot.slane %v267_v36, 4  ;;  %v271_v50 = vmul.f32 %v483_v12, %v623_v17  ;;  %v225_v51 = vadd.f32 %v224_v43, %v223_v6 }
 0x130   :  { %v256_v15 = vrot.slane %v255_v37, 1  ;;  %v273_v52 = vadd.f32 %v272_v25, %v264_v11  ;;  %v249_v53 = vadd.f32 %v248_v47, %v247_v39  ;;  %v302_v54 = vrot.slane %v269_v40, 4 }
 0x131   :  { %v239_v55 = vadd.f32 %v238_v48, %v237_v42  ;;  %v262_v56 = vrot.slane %v261_v46, 1  ;;  %v226_v8 = vrot.slane %v225_v51, 1  ;;  %v279_v57 = vadd.f32 %v278_v44, %v265_v4 }
 0x132   :  { %488 = vrcp.f32 %v233_v41  ;;  %v245_v58 = vadd.f32 %v244_v5, %v243_v31  ;;  %v297_v59 = vadd.f32 %v296_v34, %v268_v22  ;;  %v250_v60 = vrot.slane %v249_v53, 1 }
 0x133   :  { %490 = vrcp.f32 %v221_v45  ;;  %v291_v61 = vadd.f32 %v290_v49, %v267_v36  ;;  %v314_v62 = vrot.slane %v271_v50, 4  ;;  %v227_v63 = vadd.f32 %v226_v8, %v225_v51 }
 0x134   :  { %v257_v0 = vadd.f32 %v256_v15, %v255_v37  ;;  %v274_v1 = vrot.slane %v273_v52, 2  ;;  %492 = vrcp.f32 %v239_v55  ;;  %v303_v17 = vadd.f32 %v302_v54, %v269_v40 }
 0x135   :  { %v263_v2 = vadd.f32 %v262_v56, %v261_v46  ;;  %v280_v7 = vrot.slane %v279_v57, 2  ;;  %494 = vrcp.f32 %v227_v63  ;;  %v251_v9 = vadd.f32 %v250_v60, %v249_v53 }
 0x136   :  { %v286_v10 = vrot.slane %v639_v24, 2  ;;  %v309_v11 = vadd.f32 %v308_v14, %v634_v3  ;;  %496 = vrcp.f32 %v245_v58  ;;  %v292_v12 = vrot.slane %v291_v61, 2 }
 0x137   :  { %v315_v13 = vadd.f32 %v314_v62, %v271_v50  ;;  %498 = vrcp.f32 %v251_v9  ;;  %v298_v18 = vrot.slane %v297_v59, 2  ;;  %v275_v19 = vadd.f32 %v274_v1, %v273_v52 }
 0x138   :  { %500 = vrcp.f32 %v257_v0  ;;  %v281_v20 = vadd.f32 %v280_v7, %v279_v57  ;;  %v304_v21 = vrot.slane %v303_v17, 2  ;;  %v287_v22 = vadd.f32 %v286_v10, %v639_v24 }
 0x139   :  { %502 = vrcp.f32 %v263_v2  ;;  %v310_v23 = vrot.slane %v309_v11, 2  ;;  %v293_v16 = vadd.f32 %v292_v12, %v291_v61  ;;  %v316_v25 = vrot.slane %v315_v13, 2 }
 0x13a   :  { %v299_v26 = vadd.f32 %v298_v18, %v297_v59  ;;  %v276_v27 = vrot.slane %v275_v19, 1  ;;  %v282_v28 = vrot.slane %v281_v20, 1  ;;  %v305_v29 = vadd.f32 %v304_v21, %v303_v17 }
 0x13b   :  { %v288_v3 = vrot.slane %v287_v22, 1  ;;  %v311_v14 = vadd.f32 %v310_v23, %v309_v11  ;;  %v294_v30 = vrot.slane %v293_v16, 1  ;;  %v317_v31 = vadd.f32 %v316_v25, %v315_v13 }
 0x13c   :  { %v300_v33 = vrot.slane %v299_v26, 1  ;;  %v277_v35 = vadd.f32 %v276_v27, %v275_v19  ;;  %v283_v36 = vadd.f32 %v282_v28, %v281_v20  ;;  %v306_v6 = vrot.slane %v305_v29, 1 }
 0x13d   :  { %v289_v24 = vadd.f32 %v288_v3, %v287_v22  ;;  %v312_v38 = vrot.slane %v311_v14, 1  ;;  %v295_v41 = vadd.f32 %v294_v30, %v293_v16  ;;  %v318_v42 = vrot.slane %v317_v31, 1 }
 0x13e   :  { %v301_v5 = vadd.f32 %v300_v33, %v299_v26  ;;  %v307_v49 = vadd.f32 %v306_v6, %v305_v29 }
 0x13f   :  { %v489_v4 = vpop.eup %488  ;;  %v313_v51 = vadd.f32 %v312_v38, %v311_v14  ;;  %v319_v53 = vadd.f32 %v318_v42, %v317_v31 }
 0x140   :  { %v491_v32 = vpop.eup %490  ;;  %v330_v45 = vmul.f32 %v489_v4, %v289_v24 }
 0x141   :  { %v493_v34 = vpop.eup %492  ;;  %v328_v40 = vmul.f32 %v491_v32, %v277_v35 }
 0x142   :  { %v495_v37 = vpop.eup %494  ;;  %v331_v47 = vmul.f32 %v493_v34, %v295_v41 }
 0x143   :  { %v497_v39 = vpop.eup %496  ;;  %v329_v43 = vmul.f32 %v495_v37, %v283_v36 }
 0x144   :  { %v499_v44 = vpop.eup %498  ;;  %v332_v15 = vmul.f32 %v497_v39, %v301_v5 }
 0x145   :  { %v501_v46 = vpop.eup %500  ;;  %v345_v48 = vsel %vm344_vm0, %v329_v43, %v328_v40  ;;  %v333_v54 = vmul.f32 %v499_v44, %v307_v49 }
 0x146   :  { %v503_v50 = vpop.eup %502  ;;  %v347_v52 = vsel %vm346_vm1, %v330_v45, %v345_v48  ;;  %v334_v56 = vmul.f32 %v501_v46, %v313_v51 }
 0x147   :  { %v349_v55 = vsel %vm348_vm2, %v331_v47, %v347_v52  ;;  %v335_v57 = vmul.f32 %v503_v50, %v319_v53 }
 0x148   :  { %v351_v8 = vsel %vm350_vm3, %v332_v15, %v349_v55 }
 0x149   :  { %v353_v58 = vsel %vm352_vm4, %v333_v54, %v351_v8 }
 0x14a   :  { %v355_v59 = vsel %vm354_vm5, %v334_v56, %v353_v58 }
 0x14b   :  { %v357_v60 = vsel %vm356_vm6, %v335_v57, %v355_v59 }
 0x14c   :  { %359 = vst [vmem:[#allocation7] sm:$0xff] %v357_v60 }
 0x14d   :  { %364 = vsyncadd [#allocation4], 96  ;;  %s576_s2 = smov [#allocation7]  }
 0x14e   :  { %s365_s27 = sshll.u32 %s576_s2, 4  ;;  %s366_s27 = int_to_ptr.vmem [resolvable:$true] %s365_s27 }
 0x14f   :  { %s544_s28 = scalar_lea.vmem %s366_s27, 32  ;;  %s548_s29 = scalar_lea.vmem %s366_s27, 128 }
 0x150   :  { %p545_p10 = scmp.ne.s32.totalorder %s366_s27, %s544_s28  ;;  %p549_p11 = scmp.lt.s32.totalorder %s366_s27, %s366_s27 }
 0x151   :  { %p550_p12 = scmp.lt.s32.totalorder %s548_s29, %s544_s28 }
 0x153   :  { %p551_p13 = por %p550_p12, %p549_p11 }
 0x155   :  { %p552_p0 = pnand %p551_p13, %p545_p10 }
 0x157   :  { %555 = shalt.err (!%p552_p0)
}
 0x158   :  { %s577_s30 = smov 32   ;;  %s578_s4 = smov 2  }
 0x159   :  { %371 = dma.vmem_to_hbm [thread:$0]  %s366_s27, 32, %s655_s3, [#allocation4], %s577_s30, %s577_s30, %s578_s4  }
 0x15a   :  { %568 = dma.done.wait [#allocation4], 128  }
 0x15b   :  { %569 = vsyncadd [#allocation4], 4294967168 }
 0x15c   :  { %375 = vsyncpa [#allocation3], 1 }
 0x15d   :  { %376 = vsyncpa [#allocation6], 1 }
 0x15e   :  { %377 = vsyncpa [#allocation4], 1 }

</bundles_post_ra>
